<compile_context>
chip_gen: v6e
topology: v6e:2x2x1
jax: 0.10.0
libtpu: 0.0.40
codegen_flags: <defaults>
</compile_context>

<pallas_src>
import functools

import jax
import jax.numpy as jnp
from jax.experimental import pallas as pl
from jax.experimental.pallas import tpu as pltpu

_ROW_TARGET = 256   # target matmul-M rows per grid step (MXU depth on v6e/v7x)


# ----------------------------------------------------------------------------- kernel
def _resblock_kernel(x_ref, w1_ref, b1_ref, w2_ref, b2_ref, m_ref, *rest,
                     downsample: bool, learnable_sc: bool):
    """Fused ResidualBlock forward for one tile of BT images (M = BT*H rows).

    x_ref  : (1, M, K)   input rows, lane-dense (K = W*Cin), compute dtype (bf16)
    w1_ref : (3K, K)     conv1 weights: 3 vertical-tap bands stacked along K
    b1_ref : (1, K)      conv1 bias tiled over W (f32)
    w2_ref : (3K, N2)    conv2 weights (width-half of avg_pool folded in when downsampling)
    b2_ref : (1, N2)     conv2 bias tiled over Wo (f32)
    m_ref  : (2, M, K)   multiplicative per-image edge masks (f32): [keep i-1, keep i+1]
    rest   : [s_ref (K, N2), bsc_ref (1, N2)]  if learnable_sc
             [ph_ref (Mo, M)]                  if downsample (block-diag height pool)
             o_ref (1, Mo, N2)                 always last (no scratch)
    """
    refs = list(rest)
    o_ref = refs.pop()
    s_ref = bsc_ref = ph_ref = None
    if learnable_sc:
        s_ref, bsc_ref = refs.pop(0), refs.pop(0)
    if downsample:
        ph_ref = refs.pop(0)

    x = x_ref[0]                                  # (M, K) bf16
    cdt = x.dtype
    M = x.shape[0]
    xf = x.astype(jnp.float32)
    keep_up = m_ref[0]                            # 0 on the first row of each image
    keep_dn = m_ref[1]                            # 0 on the last row of each image

    def taps(v):
        # (M, K) f32 -> (M, 3K): [row i-1 | row i | row i+1] with per-image zero padding.
        # Rolls cross image seams only on rows that the masks zero out anyway.
        up = pltpu.roll(v, 1, 0) * keep_up
        dn = pltpu.roll(v, M - 1, 0) * keep_dn
        return jnp.concatenate([up, v, dn], axis=-1)

    # residual branch: ReLU -> 3x3 conv -> ReLU -> 3x3 conv; each conv is a single MXU
    # dot with contraction K = 3*W*Cin (vertical taps fused into the K dimension).
    h1 = jnp.dot(taps(jnp.maximum(xf, 0.0)).astype(cdt), w1_ref[...],
                 preferred_element_type=jnp.float32)
    h1 = jnp.maximum(h1 + b1_ref[...], 0.0)
    t = jnp.dot(taps(h1).astype(cdt), w2_ref[...],
                preferred_element_type=jnp.float32)
    t = t + b2_ref[...]

    # shortcut branch (1x1 conv folded into a block-diagonal matrix, or identity).
    if learnable_sc:
        t = t + jnp.dot(x, s_ref[...], preferred_element_type=jnp.float32) + bsc_ref[...]
    else:
        t = t + xf                                # Cin == Cout in this case

    # remaining height half of avg_pool2d(2) (width half already folded into weights):
    # one block-diagonal (per image) pooling matmul applied to residual + shortcut.
    if downsample:
        t = jnp.dot(ph_ref[...], t, preferred_element_type=jnp.float32)

    o_ref[0] = t.astype(o_ref.dtype)              # lane-dense (Mo, N2) store


# ------------------------------------------------------------------ weight preprocessing
def _conv3x3_bands(w, W):
    """HWIO (3,3,Cin,Cout) -> (3, W*Cin, W*Cout) banded matrices (one per kernel row).

    Band_ky[j_in*Cin + ci, j_out*Cout + co] = w[ky, kx, ci, co] with j_in = j_out + kx - 1
    (missing horizontal taps => zero padding in W).
    """
    Cin, Cout = int(w.shape[2]), int(w.shape[3])
    bands = []
    for ky in range(3):
        band = jnp.zeros((W, Cin, W, Cout), jnp.float32)
        for kx in range(3):
            dx = kx - 1
            j = jnp.arange(max(0, -dx), W - max(0, dx))        # valid output columns
            upd = jnp.broadcast_to(w[ky, kx], (j.shape[0], Cin, Cout))
            band = band.at[j + dx, :, j, :].set(upd)
        bands.append(band.reshape(W * Cin, W * Cout))
    return jnp.stack(bands, axis=0)


def _pool_width(mat, W, Cout):
    """Fold the width half of avg_pool2d(2) into a weight matrix's output columns."""
    lead = mat.shape[:-1]
    m = mat.reshape(*lead, W // 2, 2, Cout)
    return (0.5 * (m[..., 0, :] + m[..., 1, :])).reshape(*lead, (W // 2) * Cout)


def prepare_params(params, *, dim_in, dim_out, W, downsample,
                   compute_dtype=jnp.bfloat16):
    """Precompute banded / pooled weight matrices ONCE per weight set (cacheable)."""
    w1, b1, w2, b2, wsc, bsc = params
    learnable_sc = (dim_in != dim_out) or downsample
    Wo = W // 2 if downsample else W
    K = W * dim_in
    N2 = Wo * dim_out

    w1m = _conv3x3_bands(w1.astype(jnp.float32), W).reshape(3 * K, K)
    w2m = _conv3x3_bands(w2.astype(jnp.float32), W)                   # (3, K, W*dim_out)
    if downsample:
        w2m = _pool_width(w2m, W, dim_out)
    w2m = w2m.reshape(3 * K, N2)

    prep = {
        "w1": w1m.astype(compute_dtype),
        "b1": jnp.tile(b1.astype(jnp.float32), W).reshape(1, K),
        "w2": w2m.astype(compute_dtype),
        "b2": jnp.tile(b2.astype(jnp.float32), Wo).reshape(1, N2),
    }
    if learnable_sc:
        s = jnp.kron(jnp.eye(W, dtype=jnp.float32), wsc.astype(jnp.float32))
        if downsample:
            s = _pool_width(s, W, dim_out)
        prep["s"] = s.astype(compute_dtype)
        prep["bsc"] = jnp.tile(bsc.astype(jnp.float32), Wo).reshape(1, N2)
    return prep


# ----------------------------------------------------------------------------- wrapper
def residual_block_forward(x_nchw, prep, *, dim_in, dim_out, downsample):
    """ResidualBlock forward.  x_nchw: (B, dim_in, H, W) -> (B, dim_out, Ho, Wo)."""
    learnable_sc = (dim_in != dim_out) or downsample
    if not learnable_sc:
        assert dim_in == dim_out, "identity shortcut requires dim_in == dim_out"
    cdt = prep["w1"].dtype

    x = jnp.transpose(x_nchw, (0, 2, 3, 1))              # NCHW -> NHWC
    B, H, W, Cin = x.shape
    assert Cin == dim_in
    if downsample:
        assert H % 2 == 0 and W % 2 == 0
    Ho, Wo = (H // 2, W // 2) if downsample else (H, W)
    K = W * dim_in                    # lane width of activation rows
    N2 = Wo * dim_out                 # lane width of (width-pooled) output rows

    # Fold the batch into the matmul M dimension: BT images per grid step so every MXU
    # dot sees ~_ROW_TARGET rows instead of H.  Pad B to a multiple of BT if needed.
    BT = min(B, max(1, _ROW_TARGET // H))
    nt = -(-B // BT)                                      # cdiv
    B_pad = nt * BT
    M, Mo = BT * H, BT * Ho

    x_rows = x.reshape(B, H, K).astype(cdt)               # lane-dense rows, bf16
    if B_pad != B:
        x_rows = jnp.concatenate(
            [x_rows, jnp.zeros((B_pad - B, H, K), cdt)], axis=0)
    x_tiles = x_rows.reshape(nt, M, K)

    # Per-image vertical-edge masks (0 on rows whose up/down neighbour is zero padding).
    # Precomputed here (hoisted) so the kernel never re-derives them.
    rid = jnp.tile(jnp.arange(H, dtype=jnp.int32), BT)
    keep_up = (rid != 0).astype(jnp.float32)[:, None]
    keep_dn = (rid != H - 1).astype(jnp.float32)[:, None]
    masks = jnp.stack([jnp.broadcast_to(keep_up, (M, K)),
                       jnp.broadcast_to(keep_dn, (M, K))], axis=0)    # (2, M, K) f32

    def const_spec(shape):
        # Grid-invariant operand: same block every step.  When the grid actually
        # pipelines (>1 step) request single buffering so it isn't double-buffered.
        zeros = (0,) * len(shape)
        kwargs = {"pipeline_mode": pl.Buffered(1)} if nt > 1 else {}
        return pl.BlockSpec(shape, lambda t: zeros, **kwargs)

    inputs = [x_tiles, prep["w1"], prep["b1"], prep["w2"], prep["b2"], masks]
    in_specs = [
        pl.BlockSpec((1, M, K), lambda t: (t, 0, 0)),
        const_spec((3 * K, K)),
        const_spec((1, K)),
        const_spec((3 * K, N2)),
        const_spec((1, N2)),
        const_spec((2, M, K)),
    ]
    if learnable_sc:
        inputs += [prep["s"], prep["bsc"]]
        in_specs += [const_spec((K, N2)), const_spec((1, N2))]
    if downsample:
        io = jnp.arange(Ho)
        ph1 = (jnp.zeros((Ho, H), jnp.float32)
               .at[io, 2 * io].set(0.5)
               .at[io, 2 * io + 1].set(0.5))               # per-image height-pool matrix
        ph = jnp.kron(jnp.eye(BT, dtype=jnp.float32), ph1)  # block-diagonal over the tile
        inputs += [ph]
        in_specs += [const_spec((Mo, M))]

    # Explicit VMEM budget: grid-varying blocks double-buffered, constants single-
    # buffered, plus headroom for the in-kernel f32 temporaries (taps / accumulators).
    bpe = jnp.dtype(cdt).itemsize
    need = (2 * M * K * bpe + 2 * Mo * N2 * 4
            + sum(int(a.size) * a.dtype.itemsize for a in inputs[1:])
            + 8 * M * max(3 * K, N2) * 4)
    vmem_limit = int(min(max(2 * need, 32 * 1024 * 1024), 56 * 1024 * 1024))

    kernel = functools.partial(_resblock_kernel, downsample=downsample,
                               learnable_sc=learnable_sc)
    out_tiles = pl.pallas_call(
        kernel,
        out_shape=jax.ShapeDtypeStruct((nt, Mo, N2), jnp.float32),
        grid=(nt,),
        in_specs=in_specs,
        out_specs=pl.BlockSpec((1, Mo, N2), lambda t: (t, 0, 0)),
        compiler_params=pltpu.CompilerParams(
            dimension_semantics=("parallel",),
            vmem_limit_bytes=vmem_limit),
    )(*inputs)

    out = out_tiles.reshape(B_pad, Ho, N2)[:B].reshape(B, Ho, Wo, dim_out)
    return jnp.transpose(out, (0, 3, 1, 2))                # NHWC -> NCHW


# ----------------------------------------------------------------- params & reference
def make_params(key, dim_in, dim_out, learnable_sc):
    """Deterministic synthetic parameters (HWIO conv weights, per-channel biases)."""
    k1, k2, k3, k4, k5, k6 = jax.random.split(key, 6)
    w1 = 0.2 * jax.random.normal(k1, (3, 3, dim_in, dim_in), jnp.float32)
    b1 = 0.1 * jax.random.normal(k2, (dim_in,), jnp.float32)
    w2 = 0.2 * jax.random.normal(k3, (3, 3, dim_in, dim_out), jnp.float32)
    b2 = 0.1 * jax.random.normal(k4, (dim_out,), jnp.float32)
    if learnable_sc:
        wsc = 0.2 * jax.random.normal(k5, (dim_in, dim_out), jnp.float32)
        bsc = 0.1 * jax.random.normal(k6, (dim_out,), jnp.float32)
    else:
        wsc, bsc = None, None
    return (w1, b1, w2, b2, wsc, bsc)


def reference(x_nchw, params, *, downsample, learnable_sc):
    """Pure-JAX (f32, HIGHEST precision) reference of the PyTorch ResidualBlock."""
    w1, b1, w2, b2, wsc, bsc = params
    x = jnp.transpose(x_nchw, (0, 2, 3, 1))

    def conv(h, w, b):
        y = jax.lax.conv_general_dilated(
            h, w, (1, 1), 'SAME',
            dimension_numbers=('NHWC', 'HWIO', 'NHWC'),
            precision=jax.lax.Precision.HIGHEST)
        return y + b.reshape(1, 1, 1, -1)

    def pool(h):
        B_, H_, W_, C_ = h.shape
        return h.reshape(B_, H_ // 2, 2, W_ // 2, 2, C_).mean(axis=(2, 4))

    h = jax.nn.relu(x)
    h = conv(h, w1, b1)
    h = jax.nn.relu(h)
    h = conv(h, w2, b2)
    if downsample:
        h = pool(h)
    if learnable_sc:
        sc = conv(x, wsc.reshape(1, 1, *wsc.shape), bsc)
        if downsample:
            sc = pool(sc)
    else:
        sc = x
    return jnp.transpose(h + sc, (0, 3, 1, 2))


if __name__ == "__main__":
    key = jax.random.PRNGKey(0)
    kx1, kx2, kp1, kp2 = jax.random.split(key, 4)
    B, H, W = 2, 16, 16

    # Case 1: dim_in == dim_out, no downsample -> identity shortcut.
    dim_in, dim_out = 4, 4
    x1 = jax.random.normal(kx1, (B, dim_in, H, W), jnp.float32)
    p1 = make_params(kp1, dim_in, dim_out, learnable_sc=False)
    prep1 = prepare_params(p1, dim_in=dim_in, dim_out=dim_out, W=W, downsample=False)
    fwd1 = jax.jit(functools.partial(residual_block_forward, dim_in=dim_in,
                                     dim_out=dim_out, downsample=False))
    y1 = jax.block_until_ready(fwd1(x1, prep1))
    r1 = reference(x1, p1, downsample=False, learnable_sc=False)
    assert y1.shape == (B, dim_out, H, W)
    # Kernel matmuls use bf16 operands (f32 accumulation) -> bf16-level tolerance.
    assert bool(jnp.allclose(y1, r1, rtol=5e-2, atol=5e-2))

    # Case 2: dim_in != dim_out, downsample=True -> learnable 1x1 shortcut + avg pool.
    dim_in, dim_out = 4, 8
    x2 = jax.random.normal(kx2, (B, dim_in, H, W), jnp.float32)
    p2 = make_params(kp2, dim_in, dim_out, learnable_sc=True)
    prep2 = prepare_params(p2, dim_in=dim_in, dim_out=dim_out, W=W, downsample=True)
    fwd2 = jax.jit(functools.partial(residual_block_forward, dim_in=dim_in,
                                     dim_out=dim_out, downsample=True))
    y2 = jax.block_until_ready(fwd2(x2, prep2))
    r2 = reference(x2, p2, downsample=True, learnable_sc=True)
    assert y2.shape == (B, dim_out, H // 2, W // 2)
    assert bool(jnp.allclose(y2, r2, rtol=5e-2, atol=5e-2))

    print("KERNEL_OK")
</pallas_src>

<mosaic_0001>
module attributes {stable_mosaic.version = 11 : i64} {
  func.func @_resblock_kernel(%arg0: i32, %arg1: memref<1x32x64xbf16, #tpu.memory_space<vmem>>, %arg2: memref<192x64xbf16, #tpu.memory_space<vmem>>, %arg3: memref<1x64xf32, #tpu.memory_space<vmem>>, %arg4: memref<192x64xbf16, #tpu.memory_space<vmem>>, %arg5: memref<1x64xf32, #tpu.memory_space<vmem>>, %arg6: memref<2x32x64xf32, #tpu.memory_space<vmem>>, %arg7: memref<1x32x64xf32, #tpu.memory_space<vmem>>) attributes {dimension_semantics = [#tpu.dimension_semantics<parallel>], iteration_bounds = array<i64: 1>, scalar_prefetch = 0 : i64, scratch_operands = 0 : i64, tpu.core_type = #tpu.core_type<tc>, window_params = [{transform_indices = @transform_0, window_bounds = array<i64: 1, 32, 64>}, {pipeline_mode = #tpu.pipeline_mode<synchronous>, transform_indices = @transform_1, window_bounds = array<i64: 192, 64>}, {pipeline_mode = #tpu.pipeline_mode<synchronous>, transform_indices = @transform_2, window_bounds = array<i64: 1, 64>}, {pipeline_mode = #tpu.pipeline_mode<synchronous>, transform_indices = @transform_3, window_bounds = array<i64: 192, 64>}, {pipeline_mode = #tpu.pipeline_mode<synchronous>, transform_indices = @transform_4, window_bounds = array<i64: 1, 64>}, {pipeline_mode = #tpu.pipeline_mode<synchronous>, transform_indices = @transform_5, window_bounds = array<i64: 2, 32, 64>}, {transform_indices = @transform_6, window_bounds = array<i64: 1, 32, 64>}]} {
    %c0 = arith.constant 0 : index
    %c0_0 = arith.constant 0 : index
    %c0_1 = arith.constant 0 : index
    %0 = vector.load %arg1[%c0, %c0_0, %c0_1] : memref<1x32x64xbf16, #tpu.memory_space<vmem>>, vector<1x32x64xbf16>
    %1 = vector.shape_cast %0 : vector<1x32x64xbf16> to vector<32x64xbf16>
    %2 = arith.extf %1 : vector<32x64xbf16> to vector<32x64xf32>
    %c0_2 = arith.constant 0 : index
    %c0_3 = arith.constant 0 : index
    %c0_4 = arith.constant 0 : index
    %3 = vector.load %arg6[%c0_2, %c0_3, %c0_4] : memref<2x32x64xf32, #tpu.memory_space<vmem>>, vector<1x32x64xf32>
    %4 = vector.shape_cast %3 : vector<1x32x64xf32> to vector<32x64xf32>
    %c1 = arith.constant 1 : index
    %c0_5 = arith.constant 0 : index
    %c0_6 = arith.constant 0 : index
    %5 = vector.load %arg6[%c1, %c0_5, %c0_6] : memref<2x32x64xf32, #tpu.memory_space<vmem>>, vector<1x32x64xf32>
    %6 = vector.shape_cast %5 : vector<1x32x64xf32> to vector<32x64xf32>
    %cst = arith.constant 0.000000e+00 : f32
    %7 = vector.broadcast %cst : f32 to vector<32x64xf32>
    %8 = arith.maximumf %2, %7 : vector<32x64xf32>
    %c1_i32 = arith.constant 1 : i32
    %9 = tpu.dynamic_rotate %8 by %c1_i32 dim 0 : vector<32x64xf32>, i32 -> vector<32x64xf32>
    %10 = arith.mulf %9, %4 : vector<32x64xf32>
    %c31_i32 = arith.constant 31 : i32
    %11 = tpu.dynamic_rotate %8 by %c31_i32 dim 0 : vector<32x64xf32>, i32 -> vector<32x64xf32>
    %12 = arith.mulf %11, %6 : vector<32x64xf32>
    %13 = tpu.concatenate %10, %8, %12 in 1 : vector<32x64xf32>, vector<32x64xf32>, vector<32x64xf32> -> vector<32x192xf32>
    %14 = arith.truncf %13 : vector<32x192xf32> to vector<32x192xbf16>
    %c0_7 = arith.constant 0 : index
    %c0_8 = arith.constant 0 : index
    %15 = vector.load %arg2[%c0_7, %c0_8] : memref<192x64xbf16, #tpu.memory_space<vmem>>, vector<192x64xbf16>
    %cst_9 = arith.constant dense<0.000000e+00> : vector<32x64xf32>
    %16 = tpu.matmul %14, %15, %cst_9 {dimension_numbers = #tpu.dot_dimension_numbers<[1], [0], [0], [1], [0, 0, 1, 1], [], []>} : vector<32x192xbf16>, vector<192x64xbf16>, vector<32x64xf32> -> vector<32x64xf32>
    %c0_10 = arith.constant 0 : index
    %c0_11 = arith.constant 0 : index
    %17 = vector.load %arg3[%c0_10, %c0_11] : memref<1x64xf32, #tpu.memory_space<vmem>>, vector<1x64xf32>
    %18 = vector.broadcast %17 : vector<1x64xf32> to vector<32x64xf32>
    %19 = arith.addf %16, %18 : vector<32x64xf32>
    %cst_12 = arith.constant 0.000000e+00 : f32
    %20 = vector.broadcast %cst_12 : f32 to vector<32x64xf32>
    %21 = arith.maximumf %19, %20 : vector<32x64xf32>
    %c1_i32_13 = arith.constant 1 : i32
    %22 = tpu.dynamic_rotate %21 by %c1_i32_13 dim 0 : vector<32x64xf32>, i32 -> vector<32x64xf32>
    %23 = arith.mulf %22, %4 : vector<32x64xf32>
    %c31_i32_14 = arith.constant 31 : i32
    %24 = tpu.dynamic_rotate %21 by %c31_i32_14 dim 0 : vector<32x64xf32>, i32 -> vector<32x64xf32>
    %25 = arith.mulf %24, %6 : vector<32x64xf32>
    %26 = tpu.concatenate %23, %21, %25 in 1 : vector<32x64xf32>, vector<32x64xf32>, vector<32x64xf32> -> vector<32x192xf32>
    %27 = arith.truncf %26 : vector<32x192xf32> to vector<32x192xbf16>
    %c0_15 = arith.constant 0 : index
    %c0_16 = arith.constant 0 : index
    %28 = vector.load %arg4[%c0_15, %c0_16] : memref<192x64xbf16, #tpu.memory_space<vmem>>, vector<192x64xbf16>
    %cst_17 = arith.constant dense<0.000000e+00> : vector<32x64xf32>
    %29 = tpu.matmul %27, %28, %cst_17 {dimension_numbers = #tpu.dot_dimension_numbers<[1], [0], [0], [1], [0, 0, 1, 1], [], []>} : vector<32x192xbf16>, vector<192x64xbf16>, vector<32x64xf32> -> vector<32x64xf32>
    %c0_18 = arith.constant 0 : index
    %c0_19 = arith.constant 0 : index
    %30 = vector.load %arg5[%c0_18, %c0_19] : memref<1x64xf32, #tpu.memory_space<vmem>>, vector<1x64xf32>
    %31 = vector.broadcast %30 : vector<1x64xf32> to vector<32x64xf32>
    %32 = arith.addf %29, %31 : vector<32x64xf32>
    %33 = arith.addf %32, %2 : vector<32x64xf32>
    %c0_20 = arith.constant 0 : index
    %c0_21 = arith.constant 0 : index
    %c0_22 = arith.constant 0 : index
    %34 = vector.load %arg7[%c0_20, %c0_21, %c0_22] : memref<1x32x64xf32, #tpu.memory_space<vmem>>, vector<1x32x64xf32>
    %35 = vector.shape_cast %34 : vector<1x32x64xf32> to vector<32x64xf32>
    %36 = vector.shape_cast %33 : vector<32x64xf32> to vector<1x32x64xf32>
    tpu.vector_store %arg7[%c0_20, %c0_21, %c0_22], %36 {strides = array<i32>} : memref<1x32x64xf32, #tpu.memory_space<vmem>>, vector<1x32x64xf32>,
    return
  }
  func.func @transform_0(%arg0: i32) -> (i32, i32, i32) {
    %c0_i32 = arith.constant 0 : i32
    %c0_i32_0 = arith.constant 0 : i32
    %c0_i32_1 = arith.constant 0 : i32
    return %arg0, %c0_i32, %c0_i32_0 : i32, i32, i32
  }
  func.func @transform_1(%arg0: i32) -> (i32, i32) {
    %c0_i32 = arith.constant 0 : i32
    %c0_i32_0 = arith.constant 0 : i32
    %c0_i32_1 = arith.constant 0 : i32
    return %c0_i32, %c0_i32_0 : i32, i32
  }
  func.func @transform_2(%arg0: i32) -> (i32, i32) {
    %c0_i32 = arith.constant 0 : i32
    %c0_i32_0 = arith.constant 0 : i32
    %c0_i32_1 = arith.constant 0 : i32
    return %c0_i32, %c0_i32_0 : i32, i32
  }
  func.func @transform_3(%arg0: i32) -> (i32, i32) {
    %c0_i32 = arith.constant 0 : i32
    %c0_i32_0 = arith.constant 0 : i32
    %c0_i32_1 = arith.constant 0 : i32
    return %c0_i32, %c0_i32_0 : i32, i32
  }
  func.func @transform_4(%arg0: i32) -> (i32, i32) {
    %c0_i32 = arith.constant 0 : i32
    %c0_i32_0 = arith.constant 0 : i32
    %c0_i32_1 = arith.constant 0 : i32
    return %c0_i32, %c0_i32_0 : i32, i32
  }
  func.func @transform_5(%arg0: i32) -> (i32, i32, i32) {
    %c0_i32 = arith.constant 0 : i32
    %c0_i32_0 = arith.constant 0 : i32
    %c0_i32_1 = arith.constant 0 : i32
    %c0_i32_2 = arith.constant 0 : i32
    return %c0_i32, %c0_i32_0, %c0_i32_1 : i32, i32, i32
  }
  func.func @transform_6(%arg0: i32) -> (i32, i32, i32) {
    %c0_i32 = arith.constant 0 : i32
    %c0_i32_0 = arith.constant 0 : i32
    %c0_i32_1 = arith.constant 0 : i32
    return %arg0, %c0_i32, %c0_i32_0 : i32, i32, i32
  }
}

</mosaic_0001>

<bundles_post_ra>
// kernel: residual_block_forward.1
= control target key start
LH: loop header
LB: loop body
LE: loop exit
PB: predicated region body
PF: predicated region fallthrough
CT: control target
= control target key end

     0   :  { %v49_v0 = vlaneseq  ;;  %v567_v3 = vmov 0   ;;  %s568_s30 = smov 64   ;;  %vm89_vm2 = vcmask 523264   ;;  %s863_s0 = inlined_call_operand.vmem [shape: bf16[1,32,64], index: 0, kind: input, shape index: {}]   ;;  %s864_s1 = inlined_call_operand.vmem [shape: bf16[192,64], index: 1, kind: input, shape index: {}]   ;;  %s865_s5 = inlined_call_operand.vmem [shape: f32[2,32,64], index: 5, kind: input, shape index: {}]   ;;  %s866_s3 = inlined_call_operand.vmem [shape: bf16[192,64], index: 3, kind: input, shape index: {}]   ;;  %s867_s2 = inlined_call_operand.vmem [shape: f32[1,64], index: 2, kind: input, shape index: {}]   ;;  %s868_s4 = inlined_call_operand.vmem [shape: f32[1,64], index: 4, kind: input, shape index: {}]   ;;  %s869_s6 = inlined_call_operand.vmem [shape: f32[1,32,64], index: 6, kind: output, shape index: {}]  }
   0x1   :  { %v607_v1 = vld [vmem:[%s863_s0] sm:$0xff]   ;;  %v612_v2 = vld [vmem:[%s863_s0 + $0x8] sm:$0xff]   ;;  %207 = vmatprep.subr.bf16.mxu0 %v567_v3  ;;  %417 = vmatprep.subr.bf16.mxu1 %v567_v3  ;;  %v543_v8 = vld [vmem:[%s864_s1 + $0x38] sm:$0xff]  }
   0x2   :  { %v514_v4 = vunpack.c.l.bf16 %v607_v1  ;;  %v515_v5 = vunpack.c.h.bf16 %v607_v1  ;;  %v518_v6 = vunpack.c.l.bf16 %v612_v2  ;;  %v519_v7 = vunpack.c.h.bf16 %v612_v2  ;;  %v544_v9 = vld [vmem:[%s864_s1 + $0x30] sm:$0xff]   ;;  %208 = vmatpush1.bf16.msra.mxu0 %v543_v8  ;;  %v545_v20 = vld [vmem:[%s864_s1 + $0x28] sm:$0xff]   ;;  %v546_v30 = vld [vmem:[%s864_s1 + $0x20] sm:$0xff]  }
   0x3   :  { %v626_v10 = vshrl.u32 %v49_v0, 7  ;;  %209 = vmatprep.subr.bf16.mxu0 %v567_v3  ;;  %v670_v35 = vld [vmem:[%s865_s5 + $0x20] sm:$0xff]  ;;  %v675_v36 = vld [vmem:[%s865_s5 + $0x28] sm:$0xff]  ;;  %v547_v38 = vld [vmem:[%s864_s1 + $0x18] sm:$0xff]  }
   0x4   :  { %v41_v11 = vmax.f32 %v514_v4, 0.0  ;;  %v42_v12 = vmax.f32 %v515_v5, 0.0  ;;  %v43_v13 = vmax.f32 %v518_v6, 0.0  ;;  %v44_v14 = vmax.f32 %v519_v7, 0.0  ;;  %v685_v40 = vld [vmem:[%s865_s5 + $0x30] sm:$0xff]  ;;  %v690_v41 = vld [vmem:[%s865_s5 + $0x38] sm:$0xff] }
   0x5   :  { %vm51_vm0 = vcmp.lt.s32.totalorder %v626_v10, 1  ;;  %vm64_vm1 = vcmp.lt.s32.totalorder %v626_v10, 7  ;;  %v548_v46 = vld [vmem:[%s864_s1 + $0x10] sm:$0xff]   ;;  %v549_v47 = vld [vmem:[%s864_s1 + $0x8] sm:$0xff]   ;;  %v550_v48 = vld [vmem:[%s864_s1] sm:$0xff]  }
   0x6   :  { %v46_v15 = vrot.slane %v42_v12, 7  ;;  %v523_v16 = vpack.i.bf16 %v42_v12, %v41_v11  ;;  %v45_v17 = vrot.slane %v41_v11, 7  ;;  %v48_v18 = vrot.slane %v44_v14, 7  ;;  %210 = vmatpush1.bf16.msra.mxu0 %v544_v9  ;;  %v551_v49 = vld [vmem:[%s864_s1 + $0x58] sm:$0xff]   ;;  %v552_v50 = vld [vmem:[%s864_s1 + $0x50] sm:$0xff]   ;;  %v553_v51 = vld [vmem:[%s864_s1 + $0x48] sm:$0xff]  }
   0x7   :  { %v47_v19 = vrot.slane %v43_v13, 7  ;;  %v528_v21 = vpack.i.bf16 %v44_v14, %v43_v13  ;;  %v63_v24 = vrot.slane %v44_v14, 1  ;;  %211 = vmatprep.subr.bf16.mxu0 %v567_v3  ;;  %v60_v25 = vrot.slane %v41_v11, 1  ;;  %v554_v52 = vld [vmem:[%s864_s1 + $0x40] sm:$0xff]   ;;  %v732_v54 = vld [vmem:[%s865_s5 + $0x8] sm:$0xff]  ;;  %v739_v58 = vld [vmem:[%s865_s5 + $0x10] sm:$0xff] }
   0x8   :  { %524 = vrot.lane.b32.xlu0 %v523_v16, %s568_s30  ;;  %v54_v22 = vsel %vm51_vm0, %v45_v17, %v46_v15  ;;  %v55_v23 = vsel %vm51_vm0, %v48_v18, %v45_v17  ;;  %v61_v28 = vrot.slane %v42_v12, 1  ;;  %v62_v29 = vrot.slane %v43_v13, 1  ;;  %v727_v53 = vld [vmem:[%s865_s5] sm:$0xff]  ;;  %v744_v59 = vld [vmem:[%s865_s5 + $0x18] sm:$0xff] }
   0x9   :  { %v649_v26 = vsel %vm51_vm0, %v47_v19, %v48_v18  ;;  %v53_v27 = vsel %vm51_vm0, %v46_v15, %v47_v19  ;;  %v68_v34 = vsel %vm64_vm1, %v63_v24, %v60_v25  ;;  %v56_v55 = vmul.f32 %v55_v23, %v727_v53  ;;  %v555_v17 = vld [vmem:[%s866_s3 + $0x38] sm:$0xff]   ;;  %v556_v18 = vld [vmem:[%s866_s3 + $0x30] sm:$0xff]   ;;  %v557_v19 = vld [vmem:[%s866_s3 + $0x28] sm:$0xff]  }
   0xa   :  { %212 = vmatpush1.bf16.msra.mxu0 %v545_v20  ;;  %v66_v31 = vsel %vm64_vm1, %v61_v28, %v62_v29  ;;  %v67_v32 = vsel %vm64_vm1, %v60_v25, %v61_v28  ;;  %v65_v33 = vsel %vm64_vm1, %v62_v29, %v63_v24  ;;  %v72_v43 = vmul.f32 %v690_v41, %v68_v34  ;;  %v558_v20 = vld [vmem:[%s866_s3 + $0x20] sm:$0xff]   ;;  %v561_v23 = vld [vmem:[%s866_s3 + $0x8] sm:$0xff]   ;;  %v563_v25 = vld [vmem:[%s866_s3 + $0x58] sm:$0xff]  }
   0xb   :  { %213 = vmatprep.subr.bf16.mxu0 %v567_v3  ;;  %v69_v37 = vmul.f32 %v670_v35, %v67_v32  ;;  %v70_v39 = vmul.f32 %v675_v36, %v66_v31  ;;  %v71_v42 = vmul.f32 %v685_v40, %v65_v33  ;;  %v57_v56 = vmul.f32 %v54_v22, %v732_v54  ;;  %v560_v22 = vld [vmem:[%s866_s3 + $0x10] sm:$0xff]   ;;  %v562_v24 = vld [vmem:[%s866_s3] sm:$0xff]  }
   0xc   :  { %529 = vrot.lane.b32.xlu0 %v528_v21, %s568_s30  ;;  %v58_v0 = vmul.f32 %v53_v27, %v739_v58  ;;  %v59_v8 = vmul.f32 %v649_v26, %v744_v59  ;;  %418 = vmatpush1.bf16.msra.mxu1 %v555_v17  ;;  %v559_v21 = vld [vmem:[%s866_s3 + $0x18] sm:$0xff]   ;;  %v564_v26 = vld [vmem:[%s866_s3 + $0x50] sm:$0xff]   ;;  %v565_v27 = vld [vmem:[%s866_s3 + $0x48] sm:$0xff]  }
   0xd   :  { %v95_v44 = vpack.c.bf16 %v70_v39, %v69_v37  ;;  %v97_v45 = vpack.c.bf16 %v72_v43, %v71_v42  ;;  %419 = vmatprep.subr.bf16.mxu1 %v567_v3  ;;  %v482_v28 = vld [vmem:[%s867_s2] ss:$0 sm:$0xff] }
   0xe   :  { %214 = vmatpush1.bf16.msra.mxu0 %v546_v30  ;;  %v566_v29 = vld [vmem:[%s866_s3 + $0x40] sm:$0xff]  }
   0xf   :  { %215 = vmatprep.subr.bf16.mxu0 %v567_v3  ;;  %495 = vmatprep.mubr.msk.bf16.mxu0 %vm89_vm2, %v95_v44 }
  0x10   :  { %420 = vmatpush1.bf16.msra.mxu1 %v556_v18 }
  0x11   :  { %421 = vmatprep.subr.bf16.mxu1 %v567_v3 }
  0x12   :  { %216 = vmatpush1.bf16.msra.mxu0 %v547_v38 }
  0x13   :  { %217 = vmatprep.subr.bf16.mxu0 %v567_v3 }
  0x14   :  { %422 = vmatpush1.bf16.msra.mxu1 %v557_v19 }
  0x15   :  { %423 = vmatprep.subr.bf16.mxu1 %v567_v3 }
  0x16   :  { %218 = vmatpush1.bf16.msra.mxu0 %v548_v46 }
  0x17   :  { %219 = vmatprep.subr.bf16.mxu0 %v567_v3 }
  0x18   :  { %424 = vmatpush1.bf16.msra.mxu1 %v558_v20 }
  0x19   :  { %425 = vmatprep.subr.bf16.mxu1 %v567_v3 }
  0x1a   :  { %220 = vmatpush1.bf16.msra.mxu0 %v549_v47 }
  0x1b   :  { %221 = vmatprep.subr.bf16.mxu0 %v567_v3 }
  0x1c   :  { %426 = vmatpush1.bf16.msra.mxu1 %v559_v21 }
  0x1d   :  { %427 = vmatprep.subr.bf16.mxu1 %v567_v3 }
  0x1e   :  { %222 = vmatpush1.bf16.msra.mxu0 %v550_v48 }
  0x1f   :  { %231 = vmatprep.subr.bf16.mxu0 %v567_v3 }
  0x20   :  { %428 = vmatpush1.bf16.msra.mxu1 %v560_v22 }
  0x21   :  { %429 = vmatprep.subr.bf16.mxu1 %v567_v3 }
  0x22   :  { %232 = vmatpush2.bf16.msra.mxu0 %v551_v49 }
  0x23   :  { %233 = vmatprep.subr.bf16.mxu0 %v567_v3 }
  0x24   :  { %430 = vmatpush1.bf16.msra.mxu1 %v561_v23 }
  0x25   :  { %431 = vmatprep.subr.bf16.mxu1 %v567_v3 }
  0x26   :  { %234 = vmatpush2.bf16.msra.mxu0 %v552_v50 }
  0x27   :  { %235 = vmatprep.subr.bf16.mxu0 %v567_v3 }
  0x28   :  { %432 = vmatpush1.bf16.msra.mxu1 %v562_v24 }
  0x29   :  { %441 = vmatprep.subr.bf16.mxu1 %v567_v3 }
  0x2a   :  { %236 = vmatpush2.bf16.msra.mxu0 %v553_v51 }
  0x2b   :  { %237 = vmatprep.subr.bf16.mxu0 %v567_v3 }
  0x2c   :  { %442 = vmatpush2.bf16.msra.mxu1 %v563_v25 }
  0x2d   :  { %443 = vmatprep.subr.bf16.mxu1 %v567_v3 }
  0x2e   :  { %238 = vmatpush2.bf16.msra.mxu0 %v554_v52 }
  0x30   :  { %444 = vmatpush2.bf16.msra.mxu1 %v564_v26 }
  0x31   :  { %445 = vmatprep.subr.bf16.mxu1 %v567_v3 }
  0x34   :  { %446 = vmatpush2.bf16.msra.mxu1 %v565_v27 }
  0x35   :  { %447 = vmatprep.subr.bf16.mxu1 %v567_v3 }
  0x38   :  { %448 = vmatpush2.bf16.msra.mxu1 %v566_v29 }
  0x7a   :  { %v525_v57 = vpop.permute.xlu0 %524 }
  0x7b   :  { %v527_v60 = vunpack.i.h.bf16 %v525_v57  ;;  %v526_v61 = vunpack.i.l.bf16 %v525_v57 }
  0x7d   :  { %v90_v62 = vsel %vm89_vm2, %v56_v55, %v526_v61  ;;  %v91_v63 = vsel %vm89_vm2, %v57_v56, %v527_v60 }
  0x7e   :  { %v94_v9 = vpack.c.bf16 %v91_v63, %v90_v62  ;;  %v530_v11 = vpop.permute.xlu0 %529 }
  0x7f   :  { %v532_v12 = vunpack.i.h.bf16 %v530_v11  ;;  %v531_v13 = vunpack.i.l.bf16 %v530_v11 }
  0x80   :  { %240 = vmatmul.mubr.bf16.vlgmr.msra.gmra.mxu0 %v94_v9 }
  0x81   :  { %496 = vmatprep.mubr.msk.bf16.mxu0 %vm89_vm2, %v97_v45  ;;  %v92_v14 = vsel %vm89_vm2, %v58_v0, %v531_v13  ;;  %v93_v15 = vsel %vm89_vm2, %v59_v8, %v532_v12 }
  0x82   :  { %v96_v16 = vpack.c.bf16 %v93_v15, %v92_v14 }
  0x88   :  { %248 = vmatmul.mubr.bf16.gmra.mxu0 %v96_v16 }
 0x140   :  { %v241_v30 = vpop.f32.mrf.mxu0 }
 0x141   :  { %v242_v31 = vadd.f32 %v482_v28, %v241_v30  ;;  %v497_v30 = vld [vmem:[%s868_s4] ss:$0 sm:$0xff] }
 0x142   :  { %v243_v32 = vpop.f32.mrf.mxu0 }
 0x143   :  { %v256_v33 = vmax.f32 %v242_v31, 0.0 }
 0x144   :  { %v244_v34 = vpop.f32.mrf.mxu0 }
 0x145   :  { %v245_v37 = vadd.f32 %v482_v28, %v244_v34  ;;  %v260_v42 = vrot.slane %v256_v33, 7  ;;  %v272_v48 = vrot.slane %v256_v33, 1 }
 0x146   :  { %v246_v38 = vpop.f32.mrf.mxu0 }
 0x147   :  { %v257_v39 = vmax.f32 %v245_v37, 0.0 }
 0x148   :  { %v249_v43 = vpop.f32.mrf.mxu0 }
 0x149   :  { %v261_v3 = vrot.slane %v257_v39, 7  ;;  %v273_v44 = vrot.slane %v257_v39, 1  ;;  %v250_v45 = vadd.f32 %v482_v28, %v249_v43  ;;  %v533_v46 = vpack.i.bf16 %v257_v39, %v256_v33 }
 0x14a   :  { %v251_v47 = vpop.f32.mrf.mxu0 }
 0x14b   :  { %v266_v49 = vsel %vm51_vm0, %v260_v42, %v261_v3  ;;  %v258_v50 = vmax.f32 %v250_v45, 0.0  ;;  %534 = vrot.lane.b32.xlu1 %v533_v46, %s568_s30  ;;  %v278_v57 = vsel %vm64_vm1, %v272_v48, %v273_v44 }
 0x14c   :  { %v252_v51 = vpop.f32.mrf.mxu0  ;;  %v280_v0 = vmul.f32 %v670_v35, %v278_v57  ;;  %v269_v23 = vmul.f32 %v266_v49, %v732_v54 }
 0x14d   :  { %v262_v52 = vrot.slane %v258_v50, 7  ;;  %v274_v55 = vrot.slane %v258_v50, 1  ;;  %v253_v56 = vadd.f32 %v482_v28, %v252_v51 }
 0x14e   :  { %v254_v60 = vpop.f32.mrf.mxu0 }
 0x14f   :  { %v265_v61 = vsel %vm51_vm0, %v261_v3, %v262_v52  ;;  %v259_v62 = vmax.f32 %v253_v56, 0.0  ;;  %v277_v63 = vsel %vm64_vm1, %v273_v44, %v274_v55 }
 0x150   :  { %v281_v8 = vmul.f32 %v675_v36, %v277_v63 }
 0x151   :  { %v263_v9 = vrot.slane %v259_v62, 7  ;;  %v275_v11 = vrot.slane %v259_v62, 1  ;;  %v538_v12 = vpack.i.bf16 %v259_v62, %v258_v50 }
 0x152   :  { %v305_v13 = vpack.c.bf16 %v281_v8, %v280_v0 }
 0x153   :  { %v264_v14 = vsel %vm51_vm0, %v262_v52, %v263_v9  ;;  %v267_v15 = vsel %vm51_vm0, %v263_v9, %v260_v42  ;;  %v276_v16 = vsel %vm64_vm1, %v274_v55, %v275_v11  ;;  %v279_v17 = vsel %vm64_vm1, %v275_v11, %v272_v48  ;;  %539 = vrot.lane.b32.xlu1 %v538_v12, %s568_s30 }
 0x154   :  { %510 = vmatprep.mubr.msk.bf16.mxu1 %vm89_vm2, %v305_v13  ;;  %v282_v35 = vmul.f32 %v685_v40, %v276_v16  ;;  %v283_v36 = vmul.f32 %v690_v41, %v279_v17  ;;  %v268_v22 = vmul.f32 %v267_v15, %v727_v53  ;;  %v270_v41 = vmul.f32 %v265_v61, %v739_v58 }
 0x155   :  { %v271_v28 = vmul.f32 %v264_v14, %v744_v59 }
 0x156   :  { %v307_v18 = vpack.c.bf16 %v283_v36, %v282_v35 }
 0x1bd   :  { %v535_v19 = vpop.permute.xlu1 %534 }
 0x1be   :  { %v537_v20 = vunpack.i.h.bf16 %v535_v19  ;;  %v536_v21 = vunpack.i.l.bf16 %v535_v19 }
 0x1c0   :  { %v300_v24 = vsel %vm89_vm2, %v268_v22, %v536_v21  ;;  %v301_v10 = vsel %vm89_vm2, %v269_v23, %v537_v20 }
 0x1c1   :  { %v304_v25 = vpack.c.bf16 %v301_v10, %v300_v24 }
 0x1c3   :  { %450 = vmatmul.mubr.bf16.vlgmr.msra.gmra.mxu1 %v304_v25 }
 0x1c4   :  { %511 = vmatprep.mubr.msk.bf16.mxu1 %vm89_vm2, %v307_v18 }
 0x1c5   :  { %v540_v26 = vpop.permute.xlu1 %539 }
 0x1c6   :  { %v542_v40 = vunpack.i.h.bf16 %v540_v26  ;;  %v541_v27 = vunpack.i.l.bf16 %v540_v26 }
 0x1c8   :  { %v302_v29 = vsel %vm89_vm2, %v270_v41, %v541_v27  ;;  %v303_v53 = vsel %vm89_vm2, %v271_v28, %v542_v40 }
 0x1c9   :  { %v306_v54 = vpack.c.bf16 %v303_v53, %v302_v29 }
 0x1cb   :  { %458 = vmatmul.mubr.bf16.gmra.mxu1 %v306_v54 }
 0x283   :  { %v451_v31 = vpop.f32.mrf.mxu1 }
 0x284   :  { %v452_v32 = vadd.f32 %v497_v30, %v451_v31 }
 0x285   :  { %v453_v33 = vpop.f32.mrf.mxu1 }
 0x286   :  { %v466_v34 = vadd.f32 %v514_v4, %v452_v32 }
 0x287   :  { %v454_v37 = vpop.f32.mrf.mxu1 }
 0x288   :  { %470 = vst.msk [vmem:[%s869_s6] sm:$0xff] %vm89_vm2, %v466_v34  ;;  %v455_v58 = vadd.f32 %v497_v30, %v454_v37 }
 0x289   :  { %v456_v59 = vpop.f32.mrf.mxu1 }
 0x28a   :  { %v467_v38 = vadd.f32 %v515_v5, %v455_v58 }
 0x28b   :  { %v459_v39 = vpop.f32.mrf.mxu1 }
 0x28c   :  { %471 = vst.msk [vmem:[%s869_s6 + $0x8] sm:$0xff] %vm89_vm2, %v467_v38  ;;  %v460_v42 = vadd.f32 %v497_v30, %v459_v39 }
 0x28d   :  { %v461_v43 = vpop.f32.mrf.mxu1 }
 0x28e   :  { %v468_v4 = vadd.f32 %v518_v6, %v460_v42 }
 0x28f   :  { %v462_v3 = vpop.f32.mrf.mxu1 }
 0x290   :  { %472 = vst.msk [vmem:[%s869_s6 + $0x10] sm:$0xff] %vm89_vm2, %v468_v4  ;;  %v463_v44 = vadd.f32 %v497_v30, %v462_v3 }
 0x291   :  { %v464_v1 = vpop.f32.mrf.mxu1 }
 0x292   :  { %v469_v5 = vadd.f32 %v519_v7, %v463_v44 }
 0x294   :  { %473 = vst.msk [vmem:[%s869_s6 + $0x18] sm:$0xff] %vm89_vm2, %v469_v5 }

</bundles_post_ra>
